<compile_context>
chip_gen: v5e
topology: v5e:2x2
jax: 0.10.0
libtpu: 0.0.40
codegen_flags: <defaults>
</compile_context>

<pallas_src>
import functools

import jax
import jax.numpy as jnp
from jax import lax
from jax.experimental import pallas as pl
from jax.experimental.pallas import tpu as pltpu

EPS = 1e-5


def _round_up(x, m):
    return (x + m - 1) // m * m


def rb_kernel(masks_ref, x_ref, w1_ref, g1_ref, b1_ref, w2_ref, g2_ref, b2_ref,
              out_ref, *, W, HW, Lc, inv_cnt):
    # masks_ref: (9, Lc) f32 -- per-tap neighbor-validity masks over the flat
    #            lane grid (row 4 == interior/validity mask: lane < H*W).
    # x_ref:     (Cp, HW) f32 -- P packed samples' channels on sublanes,
    #            compact row-major spatial grid on lanes.
    # w*_ref:    (Cp, 9*Cp) f32 -- block-diagonal (over packed samples) conv
    #            weights; cols = (tap, packed in-channel).
    # g*/b*:     (Cp, 1) f32 -- instance-norm affine (tiled per packed sample).
    # out_ref:   (Cp, HW) f32 -- residual output, compact layout.
    f32 = jnp.float32
    Cp = x_ref.shape[0]

    masks = masks_ref[...]                              # (9, Lc)
    mrow = [masks[t:t + 1, :] for t in range(9)]        # (1, Lc) each
    valid = mrow[4]                                     # interior mask

    xin = x_ref[...]                                    # (Cp, HW) f32
    if Lc > HW:                                         # lane-pad to 128-multiple
        xin = jnp.concatenate([xin, jnp.zeros((Cp, Lc - HW), f32)], axis=1)

    def conv3x3(a, w_ref):
        # im2col in registers: 9 static lane rolls, each masked where the
        # corresponding neighbor falls outside the image (emulates zero pad),
        # concatenated into a single (9*Cp, Lc) MXU operand.
        blocks = []
        for ky in range(3):
            for kx in range(3):
                t = ky * 3 + kx
                off = (ky - 1) * W + (kx - 1)
                shift = (-off) % Lc
                b = a if shift == 0 else pltpu.roll(a, shift=shift, axis=1)
                if t != 4:                              # center tap needs no mask
                    b = b * mrow[t]
                blocks.append(b)
        p9 = jnp.concatenate(blocks, axis=0)            # (9*Cp, Lc)
        # One f32 MXU matmul per conv: (Cp, 9*Cp) @ (9*Cp, Lc).
        return jnp.dot(w_ref[...], p9, preferred_element_type=jnp.float32)

    def inorm(acc, g_ref, b_ref):
        # Two-pass (centered) masked stats for robustness; biased variance.
        mu = jnp.sum(acc * valid, axis=1, keepdims=True) * inv_cnt        # (Cp,1)
        cen = acc - mu
        var = jnp.sum(cen * cen * valid, axis=1, keepdims=True) * inv_cnt
        scale = g_ref[...] * lax.rsqrt(var + EPS)
        return cen * scale + b_ref[...]

    # conv1 -> IN1 -> ReLU -> conv2 -> IN2 -> residual add
    y1 = jnp.maximum(inorm(conv3x3(xin, w1_ref), g1_ref, b1_ref), 0.0)
    y2 = inorm(conv3x3(y1, w2_ref), g2_ref, b2_ref)
    res = xin + y2
    out_ref[...] = res if Lc == HW else res[:, :HW]


def rb_forward(x_nchw, params):
    """x_nchw: (N, C, H, W) float32.  Returns (N, C, H, W) float32."""
    w1, g1, b1, w2, g2, b2 = params          # torch shapes: w (Cout, Cin, 3, 3)
    N, C, H, W = x_nchw.shape
    Cout, Cin = w1.shape[0], w1.shape[1]
    assert Cin == C and Cout == C, "RB residual add requires dim_in == dim_out"
    HW = H * W
    f32 = jnp.float32

    # ---- sample packing factor: P samples share the 8 f32 sublanes ----------
    P = 1
    if C < 8 and 8 % C == 0:
        P = 8 // C
        while P > 1 and N % P != 0:
            P //= 2
    Crow = P * C                               # useful sublane rows per step
    Cp = _round_up(Crow, 8)                    # f32 sublane tile
    Lc = _round_up(HW, 128)                    # lane tile (in-kernel pad only)
    G = N // P                                 # grid steps

    # ---- activation: compact layout, metadata-only reshapes (no HBM copy) ---
    x_rows = x_nchw.astype(f32).reshape(N, C, HW)
    if Cp == Crow:
        x_in = x_rows.reshape(G * Cp, HW)                        # free reshape
    else:  # awkward C: pad packed rows to the sublane tile (rare fallback)
        x_in = x_rows.reshape(G, Crow, HW)
        x_in = jnp.pad(x_in, ((0, 0), (0, Cp - Crow), (0, 0))).reshape(G * Cp, HW)

    # ---- per-tap neighbor-validity masks over the flat lane grid ------------
    j = jnp.arange(Lc)
    r, c = j // W, j % W
    valid = j < HW
    row_ok = [r >= 1, jnp.ones_like(valid), r <= H - 2]
    col_ok = [c >= 1, jnp.ones_like(valid), c <= W - 2]
    masks = jnp.stack([(valid & row_ok[ky] & col_ok[kx]).astype(f32)
                       for ky in range(3) for kx in range(3)], axis=0)  # (9, Lc)

    # ---- weights: block-diagonal over the P packed samples -------------------
    def prep_w(w):  # (C, C, 3, 3) -> (Cp, 9*Cp) f32, cols = (tap, packed cin)
        wf = w.astype(f32)
        cols = []
        for ky in range(3):
            for kx in range(3):
                bd = jnp.kron(jnp.eye(P, dtype=f32), wf[:, :, ky, kx])  # (Crow,Crow)
                cols.append(jnp.pad(bd, ((0, Cp - Crow), (0, Cp - Crow))))
        return jnp.concatenate(cols, axis=1)

    def prep_gb(v):  # (C,) -> (Cp, 1) f32, tiled per packed sample
        return jnp.pad(jnp.tile(v.astype(f32), P), (0, Cp - Crow)).reshape(Cp, 1)

    w1m, w2m = prep_w(w1), prep_w(w2)
    g1p, b1p, g2p, b2p = prep_gb(g1), prep_gb(b1), prep_gb(g2), prep_gb(b2)

    kernel = functools.partial(rb_kernel, W=W, HW=HW, Lc=Lc,
                               inv_cnt=1.0 / float(HW))

    out_rows = pl.pallas_call(
        kernel,
        out_shape=jax.ShapeDtypeStruct((G * Cp, HW), f32),
        grid_spec=pltpu.PrefetchScalarGridSpec(
            num_scalar_prefetch=0,
            grid=(G,),
            in_specs=[
                pl.BlockSpec((9, Lc), lambda g: (0, 0)),          # tap masks
                pl.BlockSpec((Cp, HW), lambda g: (g, 0)),         # x (compact)
                pl.BlockSpec((Cp, 9 * Cp), lambda g: (0, 0)),     # w1
                pl.BlockSpec((Cp, 1), lambda g: (0, 0)),          # g1
                pl.BlockSpec((Cp, 1), lambda g: (0, 0)),          # b1
                pl.BlockSpec((Cp, 9 * Cp), lambda g: (0, 0)),     # w2
                pl.BlockSpec((Cp, 1), lambda g: (0, 0)),          # g2
                pl.BlockSpec((Cp, 1), lambda g: (0, 0)),          # b2
            ],
            out_specs=pl.BlockSpec((Cp, HW), lambda g: (g, 0)),   # out (compact)
        ),
        compiler_params=pltpu.CompilerParams(
            dimension_semantics=("parallel",),
            vmem_limit_bytes=48 * 1024 * 1024,   # <= v7x 64 MiB guidance
        ),
    )(masks, x_in, w1m, g1p, b1p, w2m, g2p, b2p)

    # drop (rare) packed-row padding, restore (N, C, H, W) -- free reshapes
    out = out_rows.reshape(G, Cp, HW)[:, :Crow, :]
    return out.reshape(N, C, H, W)


def rb_reference(x, params):
    """Pure-JAX f32 reference matching PyTorch RB.forward (training-mode IN)."""
    w1, g1, b1, w2, g2, b2 = params

    def conv(y, w):
        return lax.conv_general_dilated(
            y, w, window_strides=(1, 1), padding=((1, 1), (1, 1)),
            dimension_numbers=('NCHW', 'OIHW', 'NCHW'),
            precision=lax.Precision.HIGHEST)

    def inorm(y, g, b):
        mu = jnp.mean(y, axis=(2, 3), keepdims=True)
        var = jnp.mean((y - mu) ** 2, axis=(2, 3), keepdims=True)
        return ((y - mu) * lax.rsqrt(var + EPS)
                * g.reshape(1, -1, 1, 1) + b.reshape(1, -1, 1, 1))

    y = jnp.maximum(inorm(conv(x, w1), g1, b1), 0.0)
    y = inorm(conv(y, w2), g2, b2)
    return x + y


if __name__ == "__main__":
    # N=4 so that with C=4 (P=2 packing) the grid still has 2 parallel steps.
    N, C, H, W = 4, 4, 16, 16
    key = jax.random.PRNGKey(0)
    kx, k1, k2, kg1, kb1, kg2, kb2 = jax.random.split(key, 7)

    x = jax.random.normal(kx, (N, C, H, W), jnp.float32)
    w1 = 0.1 * jax.random.normal(k1, (C, C, 3, 3), jnp.float32)
    w2 = 0.1 * jax.random.normal(k2, (C, C, 3, 3), jnp.float32)
    g1 = 1.0 + 0.1 * jax.random.normal(kg1, (C,), jnp.float32)
    b1 = 0.1 * jax.random.normal(kb1, (C,), jnp.float32)
    g2 = 1.0 + 0.1 * jax.random.normal(kg2, (C,), jnp.float32)
    b2 = 0.1 * jax.random.normal(kb2, (C,), jnp.float32)
    params = (w1, g1, b1, w2, g2, b2)

    out = jax.block_until_ready(jax.jit(rb_forward)(x, params))
    ref = jax.block_until_ready(rb_reference(x, params))

    assert out.shape == (N, C, H, W)
    # All-f32 kernel (f32 MXU operands) vs f32 reference -> tight tolerances.
    max_err = float(jnp.max(jnp.abs(out - ref)))
    rel_err = float(jnp.linalg.norm(out - ref) / jnp.linalg.norm(ref))
    assert max_err < 5e-3 and rel_err < 5e-4, (max_err, rel_err)
    print("KERNEL_OK")
</pallas_src>

<mosaic_0001>
module attributes {stable_mosaic.version = 11 : i64} {
  func.func @rb_kernel(%arg0: i32, %arg1: memref<9x256xf32, #tpu.memory_space<vmem>>, %arg2: memref<8x256xf32, #tpu.memory_space<vmem>>, %arg3: memref<8x72xf32, #tpu.memory_space<vmem>>, %arg4: memref<8x1xf32, #tpu.memory_space<vmem>>, %arg5: memref<8x1xf32, #tpu.memory_space<vmem>>, %arg6: memref<8x72xf32, #tpu.memory_space<vmem>>, %arg7: memref<8x1xf32, #tpu.memory_space<vmem>>, %arg8: memref<8x1xf32, #tpu.memory_space<vmem>>, %arg9: memref<8x256xf32, #tpu.memory_space<vmem>>) attributes {dimension_semantics = [#tpu.dimension_semantics<parallel>], iteration_bounds = array<i64: 2>, scalar_prefetch = 0 : i64, scratch_operands = 0 : i64, tpu.core_type = #tpu.core_type<tc>, window_params = [{pipeline_mode = #tpu.pipeline_mode<synchronous>, transform_indices = @transform_0, window_bounds = array<i64: 9, 256>}, {transform_indices = @transform_1, window_bounds = array<i64: 8, 256>}, {pipeline_mode = #tpu.pipeline_mode<synchronous>, transform_indices = @transform_2, window_bounds = array<i64: 8, 72>}, {pipeline_mode = #tpu.pipeline_mode<synchronous>, transform_indices = @transform_3, window_bounds = array<i64: 8, 1>}, {pipeline_mode = #tpu.pipeline_mode<synchronous>, transform_indices = @transform_4, window_bounds = array<i64: 8, 1>}, {pipeline_mode = #tpu.pipeline_mode<synchronous>, transform_indices = @transform_5, window_bounds = array<i64: 8, 72>}, {pipeline_mode = #tpu.pipeline_mode<synchronous>, transform_indices = @transform_6, window_bounds = array<i64: 8, 1>}, {pipeline_mode = #tpu.pipeline_mode<synchronous>, transform_indices = @transform_7, window_bounds = array<i64: 8, 1>}, {transform_indices = @transform_8, window_bounds = array<i64: 8, 256>}]} {
    %c0 = arith.constant 0 : index
    %c0_0 = arith.constant 0 : index
    %0 = vector.load %arg1[%c0, %c0_0] : memref<9x256xf32, #tpu.memory_space<vmem>>, vector<9x256xf32>
    %1 = vector.extract_strided_slice %0 {offsets = [0, 0], sizes = [1, 256], strides = [1, 1]} : vector<9x256xf32> to vector<1x256xf32>
    %2 = vector.extract_strided_slice %0 {offsets = [1, 0], sizes = [1, 256], strides = [1, 1]} : vector<9x256xf32> to vector<1x256xf32>
    %3 = vector.extract_strided_slice %0 {offsets = [2, 0], sizes = [1, 256], strides = [1, 1]} : vector<9x256xf32> to vector<1x256xf32>
    %4 = vector.extract_strided_slice %0 {offsets = [3, 0], sizes = [1, 256], strides = [1, 1]} : vector<9x256xf32> to vector<1x256xf32>
    %5 = vector.extract_strided_slice %0 {offsets = [4, 0], sizes = [1, 256], strides = [1, 1]} : vector<9x256xf32> to vector<1x256xf32>
    %6 = vector.extract_strided_slice %0 {offsets = [5, 0], sizes = [1, 256], strides = [1, 1]} : vector<9x256xf32> to vector<1x256xf32>
    %7 = vector.extract_strided_slice %0 {offsets = [6, 0], sizes = [1, 256], strides = [1, 1]} : vector<9x256xf32> to vector<1x256xf32>
    %8 = vector.extract_strided_slice %0 {offsets = [7, 0], sizes = [1, 256], strides = [1, 1]} : vector<9x256xf32> to vector<1x256xf32>
    %9 = vector.extract_strided_slice %0 {offsets = [8, 0], sizes = [1, 256], strides = [1, 1]} : vector<9x256xf32> to vector<1x256xf32>
    %c0_1 = arith.constant 0 : index
    %c0_2 = arith.constant 0 : index
    %10 = vector.load %arg2[%c0_1, %c0_2] : memref<8x256xf32, #tpu.memory_space<vmem>>, vector<8x256xf32>
    %c17_i32 = arith.constant 17 : i32
    %11 = tpu.dynamic_rotate %10 by %c17_i32 dim 1 : vector<8x256xf32>, i32 -> vector<8x256xf32>
    %12 = vector.broadcast %1 : vector<1x256xf32> to vector<8x256xf32>
    %13 = arith.mulf %11, %12 : vector<8x256xf32>
    %c16_i32 = arith.constant 16 : i32
    %14 = tpu.dynamic_rotate %10 by %c16_i32 dim 1 : vector<8x256xf32>, i32 -> vector<8x256xf32>
    %15 = vector.broadcast %2 : vector<1x256xf32> to vector<8x256xf32>
    %16 = arith.mulf %14, %15 : vector<8x256xf32>
    %c15_i32 = arith.constant 15 : i32
    %17 = tpu.dynamic_rotate %10 by %c15_i32 dim 1 : vector<8x256xf32>, i32 -> vector<8x256xf32>
    %18 = vector.broadcast %3 : vector<1x256xf32> to vector<8x256xf32>
    %19 = arith.mulf %17, %18 : vector<8x256xf32>
    %c1_i32 = arith.constant 1 : i32
    %20 = tpu.dynamic_rotate %10 by %c1_i32 dim 1 : vector<8x256xf32>, i32 -> vector<8x256xf32>
    %21 = vector.broadcast %4 : vector<1x256xf32> to vector<8x256xf32>
    %22 = arith.mulf %20, %21 : vector<8x256xf32>
    %c255_i32 = arith.constant 255 : i32
    %23 = tpu.dynamic_rotate %10 by %c255_i32 dim 1 : vector<8x256xf32>, i32 -> vector<8x256xf32>
    %24 = vector.broadcast %6 : vector<1x256xf32> to vector<8x256xf32>
    %25 = arith.mulf %23, %24 : vector<8x256xf32>
    %c241_i32 = arith.constant 241 : i32
    %26 = tpu.dynamic_rotate %10 by %c241_i32 dim 1 : vector<8x256xf32>, i32 -> vector<8x256xf32>
    %27 = vector.broadcast %7 : vector<1x256xf32> to vector<8x256xf32>
    %28 = arith.mulf %26, %27 : vector<8x256xf32>
    %c240_i32 = arith.constant 240 : i32
    %29 = tpu.dynamic_rotate %10 by %c240_i32 dim 1 : vector<8x256xf32>, i32 -> vector<8x256xf32>
    %30 = vector.broadcast %8 : vector<1x256xf32> to vector<8x256xf32>
    %31 = arith.mulf %29, %30 : vector<8x256xf32>
    %c239_i32 = arith.constant 239 : i32
    %32 = tpu.dynamic_rotate %10 by %c239_i32 dim 1 : vector<8x256xf32>, i32 -> vector<8x256xf32>
    %33 = vector.broadcast %9 : vector<1x256xf32> to vector<8x256xf32>
    %34 = arith.mulf %32, %33 : vector<8x256xf32>
    %35 = tpu.concatenate %13, %16, %19, %22, %10, %25, %28, %31, %34 in 0 : vector<8x256xf32>, vector<8x256xf32>, vector<8x256xf32>, vector<8x256xf32>, vector<8x256xf32>, vector<8x256xf32>, vector<8x256xf32>, vector<8x256xf32>, vector<8x256xf32> -> vector<72x256xf32>
    %c0_3 = arith.constant 0 : index
    %c0_4 = arith.constant 0 : index
    %36 = vector.load %arg3[%c0_3, %c0_4] : memref<8x72xf32, #tpu.memory_space<vmem>>, vector<8x72xf32>
    %cst = arith.constant dense<0.000000e+00> : vector<8x256xf32>
    %37 = tpu.matmul %36, %35, %cst {dimension_numbers = #tpu.dot_dimension_numbers<[1], [0], [0], [1], [0, 0, 1, 1], [], []>} : vector<8x72xf32>, vector<72x256xf32>, vector<8x256xf32> -> vector<8x256xf32>
    %38 = vector.broadcast %5 : vector<1x256xf32> to vector<8x256xf32>
    %39 = arith.mulf %37, %38 : vector<8x256xf32>
    %cst_5 = arith.constant dense<0.000000e+00> : vector<8xf32>
    %40 = vector.multi_reduction <add>, %39, %cst_5 [1] : vector<8x256xf32> to vector<8xf32>
    %41 = vector.shape_cast %40 : vector<8xf32> to vector<8x1xf32>
    %cst_6 = arith.constant 3.906250e-03 : f32
    %42 = vector.broadcast %cst_6 : f32 to vector<8x1xf32>
    %43 = arith.mulf %41, %42 : vector<8x1xf32>
    %44 = vector.broadcast %43 : vector<8x1xf32> to vector<8x256xf32>
    %45 = arith.subf %37, %44 : vector<8x256xf32>
    %46 = arith.mulf %45, %45 : vector<8x256xf32>
    %47 = vector.broadcast %5 : vector<1x256xf32> to vector<8x256xf32>
    %48 = arith.mulf %46, %47 : vector<8x256xf32>
    %cst_7 = arith.constant dense<0.000000e+00> : vector<8xf32>
    %49 = vector.multi_reduction <add>, %48, %cst_7 [1] : vector<8x256xf32> to vector<8xf32>
    %50 = vector.shape_cast %49 : vector<8xf32> to vector<8x1xf32>
    %cst_8 = arith.constant 3.906250e-03 : f32
    %51 = vector.broadcast %cst_8 : f32 to vector<8x1xf32>
    %52 = arith.mulf %50, %51 : vector<8x1xf32>
    %c0_9 = arith.constant 0 : index
    %c0_10 = arith.constant 0 : index
    %53 = vector.load %arg4[%c0_9, %c0_10] : memref<8x1xf32, #tpu.memory_space<vmem>>, vector<8x1xf32>
    %cst_11 = arith.constant 9.99999974E-6 : f32
    %54 = vector.broadcast %cst_11 : f32 to vector<8x1xf32>
    %55 = arith.addf %52, %54 : vector<8x1xf32>
    %56 = math.rsqrt %55 : vector<8x1xf32>
    %57 = arith.mulf %53, %56 : vector<8x1xf32>
    %58 = vector.broadcast %57 : vector<8x1xf32> to vector<8x256xf32>
    %59 = arith.mulf %45, %58 : vector<8x256xf32>
    %c0_12 = arith.constant 0 : index
    %c0_13 = arith.constant 0 : index
    %60 = vector.load %arg5[%c0_12, %c0_13] : memref<8x1xf32, #tpu.memory_space<vmem>>, vector<8x1xf32>
    %61 = vector.broadcast %60 : vector<8x1xf32> to vector<8x256xf32>
    %62 = arith.addf %59, %61 : vector<8x256xf32>
    %cst_14 = arith.constant 0.000000e+00 : f32
    %63 = vector.broadcast %cst_14 : f32 to vector<8x256xf32>
    %64 = arith.maximumf %62, %63 : vector<8x256xf32>
    %c17_i32_15 = arith.constant 17 : i32
    %65 = tpu.dynamic_rotate %64 by %c17_i32_15 dim 1 : vector<8x256xf32>, i32 -> vector<8x256xf32>
    %66 = vector.broadcast %1 : vector<1x256xf32> to vector<8x256xf32>
    %67 = arith.mulf %65, %66 : vector<8x256xf32>
    %c16_i32_16 = arith.constant 16 : i32
    %68 = tpu.dynamic_rotate %64 by %c16_i32_16 dim 1 : vector<8x256xf32>, i32 -> vector<8x256xf32>
    %69 = vector.broadcast %2 : vector<1x256xf32> to vector<8x256xf32>
    %70 = arith.mulf %68, %69 : vector<8x256xf32>
    %c15_i32_17 = arith.constant 15 : i32
    %71 = tpu.dynamic_rotate %64 by %c15_i32_17 dim 1 : vector<8x256xf32>, i32 -> vector<8x256xf32>
    %72 = vector.broadcast %3 : vector<1x256xf32> to vector<8x256xf32>
    %73 = arith.mulf %71, %72 : vector<8x256xf32>
    %c1_i32_18 = arith.constant 1 : i32
    %74 = tpu.dynamic_rotate %64 by %c1_i32_18 dim 1 : vector<8x256xf32>, i32 -> vector<8x256xf32>
    %75 = vector.broadcast %4 : vector<1x256xf32> to vector<8x256xf32>
    %76 = arith.mulf %74, %75 : vector<8x256xf32>
    %c255_i32_19 = arith.constant 255 : i32
    %77 = tpu.dynamic_rotate %64 by %c255_i32_19 dim 1 : vector<8x256xf32>, i32 -> vector<8x256xf32>
    %78 = vector.broadcast %6 : vector<1x256xf32> to vector<8x256xf32>
    %79 = arith.mulf %77, %78 : vector<8x256xf32>
    %c241_i32_20 = arith.constant 241 : i32
    %80 = tpu.dynamic_rotate %64 by %c241_i32_20 dim 1 : vector<8x256xf32>, i32 -> vector<8x256xf32>
    %81 = vector.broadcast %7 : vector<1x256xf32> to vector<8x256xf32>
    %82 = arith.mulf %80, %81 : vector<8x256xf32>
    %c240_i32_21 = arith.constant 240 : i32
    %83 = tpu.dynamic_rotate %64 by %c240_i32_21 dim 1 : vector<8x256xf32>, i32 -> vector<8x256xf32>
    %84 = vector.broadcast %8 : vector<1x256xf32> to vector<8x256xf32>
    %85 = arith.mulf %83, %84 : vector<8x256xf32>
    %c239_i32_22 = arith.constant 239 : i32
    %86 = tpu.dynamic_rotate %64 by %c239_i32_22 dim 1 : vector<8x256xf32>, i32 -> vector<8x256xf32>
    %87 = vector.broadcast %9 : vector<1x256xf32> to vector<8x256xf32>
    %88 = arith.mulf %86, %87 : vector<8x256xf32>
    %89 = tpu.concatenate %67, %70, %73, %76, %64, %79, %82, %85, %88 in 0 : vector<8x256xf32>, vector<8x256xf32>, vector<8x256xf32>, vector<8x256xf32>, vector<8x256xf32>, vector<8x256xf32>, vector<8x256xf32>, vector<8x256xf32>, vector<8x256xf32> -> vector<72x256xf32>
    %c0_23 = arith.constant 0 : index
    %c0_24 = arith.constant 0 : index
    %90 = vector.load %arg6[%c0_23, %c0_24] : memref<8x72xf32, #tpu.memory_space<vmem>>, vector<8x72xf32>
    %cst_25 = arith.constant dense<0.000000e+00> : vector<8x256xf32>
    %91 = tpu.matmul %90, %89, %cst_25 {dimension_numbers = #tpu.dot_dimension_numbers<[1], [0], [0], [1], [0, 0, 1, 1], [], []>} : vector<8x72xf32>, vector<72x256xf32>, vector<8x256xf32> -> vector<8x256xf32>
    %92 = vector.broadcast %5 : vector<1x256xf32> to vector<8x256xf32>
    %93 = arith.mulf %91, %92 : vector<8x256xf32>
    %cst_26 = arith.constant dense<0.000000e+00> : vector<8xf32>
    %94 = vector.multi_reduction <add>, %93, %cst_26 [1] : vector<8x256xf32> to vector<8xf32>
    %95 = vector.shape_cast %94 : vector<8xf32> to vector<8x1xf32>
    %cst_27 = arith.constant 3.906250e-03 : f32
    %96 = vector.broadcast %cst_27 : f32 to vector<8x1xf32>
    %97 = arith.mulf %95, %96 : vector<8x1xf32>
    %98 = vector.broadcast %97 : vector<8x1xf32> to vector<8x256xf32>
    %99 = arith.subf %91, %98 : vector<8x256xf32>
    %100 = arith.mulf %99, %99 : vector<8x256xf32>
    %101 = vector.broadcast %5 : vector<1x256xf32> to vector<8x256xf32>
    %102 = arith.mulf %100, %101 : vector<8x256xf32>
    %cst_28 = arith.constant dense<0.000000e+00> : vector<8xf32>
    %103 = vector.multi_reduction <add>, %102, %cst_28 [1] : vector<8x256xf32> to vector<8xf32>
    %104 = vector.shape_cast %103 : vector<8xf32> to vector<8x1xf32>
    %cst_29 = arith.constant 3.906250e-03 : f32
    %105 = vector.broadcast %cst_29 : f32 to vector<8x1xf32>
    %106 = arith.mulf %104, %105 : vector<8x1xf32>
    %c0_30 = arith.constant 0 : index
    %c0_31 = arith.constant 0 : index
    %107 = vector.load %arg7[%c0_30, %c0_31] : memref<8x1xf32, #tpu.memory_space<vmem>>, vector<8x1xf32>
    %cst_32 = arith.constant 9.99999974E-6 : f32
    %108 = vector.broadcast %cst_32 : f32 to vector<8x1xf32>
    %109 = arith.addf %106, %108 : vector<8x1xf32>
    %110 = math.rsqrt %109 : vector<8x1xf32>
    %111 = arith.mulf %107, %110 : vector<8x1xf32>
    %112 = vector.broadcast %111 : vector<8x1xf32> to vector<8x256xf32>
    %113 = arith.mulf %99, %112 : vector<8x256xf32>
    %c0_33 = arith.constant 0 : index
    %c0_34 = arith.constant 0 : index
    %114 = vector.load %arg8[%c0_33, %c0_34] : memref<8x1xf32, #tpu.memory_space<vmem>>, vector<8x1xf32>
    %115 = vector.broadcast %114 : vector<8x1xf32> to vector<8x256xf32>
    %116 = arith.addf %113, %115 : vector<8x256xf32>
    %117 = arith.addf %10, %116 : vector<8x256xf32>
    %c0_35 = arith.constant 0 : index
    %c0_36 = arith.constant 0 : index
    %118 = vector.load %arg9[%c0_35, %c0_36] : memref<8x256xf32, #tpu.memory_space<vmem>>, vector<8x256xf32>
    tpu.vector_store %arg9[%c0_35, %c0_36], %117 {strides = array<i32>} : memref<8x256xf32, #tpu.memory_space<vmem>>, vector<8x256xf32>,
    return
  }
  func.func @transform_0(%arg0: i32) -> (i32, i32) {
    %c0_i32 = arith.constant 0 : i32
    %c0_i32_0 = arith.constant 0 : i32
    %c0_i32_1 = arith.constant 0 : i32
    return %c0_i32, %c0_i32_0 : i32, i32
  }
  func.func @transform_1(%arg0: i32) -> (i32, i32) {
    %c0_i32 = arith.constant 0 : i32
    %c0_i32_0 = arith.constant 0 : i32
    return %arg0, %c0_i32 : i32, i32
  }
  func.func @transform_2(%arg0: i32) -> (i32, i32) {
    %c0_i32 = arith.constant 0 : i32
    %c0_i32_0 = arith.constant 0 : i32
    %c0_i32_1 = arith.constant 0 : i32
    return %c0_i32, %c0_i32_0 : i32, i32
  }
  func.func @transform_3(%arg0: i32) -> (i32, i32) {
    %c0_i32 = arith.constant 0 : i32
    %c0_i32_0 = arith.constant 0 : i32
    %c0_i32_1 = arith.constant 0 : i32
    return %c0_i32, %c0_i32_0 : i32, i32
  }
  func.func @transform_4(%arg0: i32) -> (i32, i32) {
    %c0_i32 = arith.constant 0 : i32
    %c0_i32_0 = arith.constant 0 : i32
    %c0_i32_1 = arith.constant 0 : i32
    return %c0_i32, %c0_i32_0 : i32, i32
  }
  func.func @transform_5(%arg0: i32) -> (i32, i32) {
    %c0_i32 = arith.constant 0 : i32
    %c0_i32_0 = arith.constant 0 : i32
    %c0_i32_1 = arith.constant 0 : i32
    return %c0_i32, %c0_i32_0 : i32, i32
  }
  func.func @transform_6(%arg0: i32) -> (i32, i32) {
    %c0_i32 = arith.constant 0 : i32
    %c0_i32_0 = arith.constant 0 : i32
    %c0_i32_1 = arith.constant 0 : i32
    return %c0_i32, %c0_i32_0 : i32, i32
  }
  func.func @transform_7(%arg0: i32) -> (i32, i32) {
    %c0_i32 = arith.constant 0 : i32
    %c0_i32_0 = arith.constant 0 : i32
    %c0_i32_1 = arith.constant 0 : i32
    return %c0_i32, %c0_i32_0 : i32, i32
  }
  func.func @transform_8(%arg0: i32) -> (i32, i32) {
    %c0_i32 = arith.constant 0 : i32
    %c0_i32_0 = arith.constant 0 : i32
    return %arg0, %c0_i32 : i32, i32
  }
}

</mosaic_0001>

<bundles_post_ra>
// kernel: tile.23
= control target key start
LH: loop header
LB: loop body
LE: loop exit
PB: predicated region body
PF: predicated region fallthrough
CT: control target
= control target key end

     0   :  { %s22_s0 = inlined_call_operand.vmem [shape: f32[4], index: 0, kind: input, shape index: {}]   ;;  %s23_s1 = inlined_call_operand.vmem [shape: f32[2,4], index: 1, kind: output, shape index: {}]  }
   0x1   :  { %v4_v0 = vld [vmem:[%s22_s0] ss:$0 sm:$0xff] }
   0x2   :  { %5 = vst [vmem:[%s23_s1] sm:$0x3] %v4_v0 }

// kernel: rb_forward.1
= control target key start
LH: loop header
LB: loop body
LE: loop exit
PB: predicated region body
PF: predicated region fallthrough
CT: control target
= control target key end

     0   :  { %s809_s27 = smov 0   ;;  %s1093_s0 = inlined_call_operand.vmem [shape: f32[9,256], index: 0, kind: input, shape index: {}]   ;;  %s1094_s1 = inlined_call_operand.vmem [shape: f32[16,256], index: 1, kind: input, shape index: {}]   ;;  %s1095_s2 = inlined_call_operand.vmem [shape: f32[8,72], index: 2, kind: input, shape index: {}]   ;;  %s1096_s3 = inlined_call_operand.vmem [shape: f32[8,1], index: 3, kind: input, shape index: {}]   ;;  %s1097_s4 = inlined_call_operand.vmem [shape: f32[8,1], index: 4, kind: input, shape index: {}]   ;;  %s1098_s5 = inlined_call_operand.vmem [shape: f32[8,72], index: 5, kind: input, shape index: {}]   ;;  %s1099_s6 = inlined_call_operand.vmem [shape: f32[8,1], index: 6, kind: input, shape index: {}]   ;;  %s1100_s7 = inlined_call_operand.vmem [shape: f32[8,1], index: 7, kind: input, shape index: {}]   ;;  %s1101_s8 = inlined_call_operand.vmem [shape: f32[16,256], index: 8, kind: output, shape index: {}]  }
   0x1 LB: > { %s706_s28 = sadd.s32 4294967295, %s753_s27   ;;  %p710_p0 = scmp.ge.s32.totalorder %s753_s27, 1  ;;  %s753_s27 = sphi %s809_s27, %s18_s27  }
   0x2   : > { %p262_p1 = scmp.lt.s32.totalorder %s753_s27, 3 }
   0x4   : > { %p263_p2 = pnand %p710_p0, %p262_p1 }
   0x5   : > { %p296_p3 = scmp.lt.s32.totalorder (!%p263_p2), %s706_s28, 1  ;;  %s755_s11 = smov (!%p263_p2), 112  }
   0x6   : > { %266 = sbr.rel (%p263_p2) target bundleno = 1398 (0x576), region = 52  ;;  %s756_s12 = smov (!%p263_p2), 111  }
   0x7   : > { %s757_s13 = smov (!%p263_p2), 113   ;;  %s758_s14 = smov (!%p263_p2), 127  }
   0x8   : > { %s759_s15 = smov (!%p263_p2), 1   ;;  %s760_s16 = smov (!%p263_p2), 15  }
   0x9   : > { %s761_s17 = smov (!%p263_p2), 16   ;;  %s762_s18 = smov (!%p263_p2), 17  }
   0xb   : > { %s1103_s28 = smov (!%p296_p3, %s706_s28), 1  ;;  %v316_v3 = vlaneseq  ;;  %v866_v8 = vld [vmem:[%s1093_s0] sm:$0xff]  ;;  %v871_v9 = vld [vmem:[%s1093_s0 + $0x8] sm:$0xff]  ;;  %v878_v10 = vld [vmem:[%s1093_s0 + $0x10] ss:$0 sm:$0xff]  ;;  %vm403_vm8 = vcmask 588800  }
   0xc   : > { %s721_s29 = sshll.u32 %s1103_s28, 4  ;;  %v883_v11 = vld [vmem:[%s1093_s0 + $0x18] ss:$0 sm:$0xff]  ;;  %v387_v14 = vperm.slane %v866_v8, 7  ;;  %v388_v15 = vperm.slane %v871_v9, 7  ;;  %v376_v22 = vperm.slane %v866_v8, 6 }
   0xd   : > { %s300_s10 = scalar_lea.vmem %s1094_s1, %s721_s29  ;;  %v861_v6 = vand.u32 127, %v316_v3  ;;  %v377_v23 = vperm.slane %v871_v9, 6  ;;  %v365_v31 = vperm.slane %v866_v8, 5  ;;  %v366_v32 = vperm.slane %v871_v9, 5  ;;  %s305_s22 = scalar_lea.vmem %s1101_s8, %s721_s29 }
   0xe   : > { %v825_v0 = vld [vmem:[%s300_s10] sm:$0xff]  ;;  %v833_v1 = vld [vmem:[%s300_s10 + $0x8] sm:$0xff]  ;;  %v354_v39 = vperm.slane %v866_v8, 3  ;;  %v355_v40 = vperm.slane %v871_v9, 3  ;;  %v343_v42 = vperm.slane %v866_v8, 2  ;;  %v344_v43 = vperm.slane %v871_v9, 2 }
   0xf   : > { %380 = vrot.lane.b32.xlu1 %v825_v0, %s755_s11  ;;  %391 = vrot.lane.b32.xlu0 %v825_v0, %s756_s12  ;;  %vm384_vm0 = vcmp.lt.s32.totalorder %v861_v6, 112  ;;  %vm395_vm1 = vcmp.lt.s32.totalorder %v861_v6, 111  ;;  %vm373_vm2 = vcmp.lt.s32.totalorder %v861_v6, 113  ;;  %vm362_vm3 = vcmp.lt.s32.totalorder %v861_v6, 127 }
  0x10   : > { %369 = vrot.lane.b32.xlu2 %v825_v0, %s757_s13  ;;  %vm351_vm4 = vcmp.lt.s32.totalorder %v861_v6, 1  ;;  %vm340_vm5 = vcmp.lt.s32.totalorder %v861_v6, 15  ;;  %vm329_vm6 = vcmp.lt.s32.totalorder %v861_v6, 16  ;;  %v332_v54 = vperm.slane %v866_v8, 1 }
  0x11   : > { %v333_v55 = vperm.slane %v871_v9, 1  ;;  %vm318_vm7 = vcmp.lt.s32.totalorder %v861_v6, 17  ;;  %v321_v63 = vperm.slane %v866_v8, 0 }
  0x17   : > { %382 = vrot.lane.b32.xlu1 %v833_v1, %s755_s11  ;;  %393 = vrot.lane.b32.xlu0 %v833_v1, %s756_s12 }
  0x18   : > { %371 = vrot.lane.b32.xlu2 %v833_v1, %s757_s13 }
  0x1f   : > { %360 = vrot.lane.b32.xlu1 %v833_v1, %s758_s14  ;;  %358 = vrot.lane.b32.xlu0 %v825_v0, %s758_s14 }
  0x20   : > { %347 = vrot.lane.b32.xlu2 %v825_v0, %s759_s15 }
  0x27   : > { %336 = vrot.lane.b32.xlu1 %v825_v0, %s760_s16  ;;  %349 = vrot.lane.b32.xlu0 %v833_v1, %s759_s15 }
  0x28   : > { %338 = vrot.lane.b32.xlu2 %v833_v1, %s760_s16 }
  0x2f   : > { %327 = vrot.lane.b32.xlu1 %v833_v1, %s761_s17  ;;  %325 = vrot.lane.b32.xlu0 %v825_v0, %s761_s17 }
  0x30   : > { %312 = vrot.lane.b32.xlu2 %v825_v0, %s762_s18 }
  0x37   : > { %314 = vrot.lane.b32.xlu0 %v833_v1, %s762_s18 }
  0x6a   : > { %v370_v2 = vpop.permute.xlu2 %369 }
  0x72   : > { %v372_v7 = vpop.permute.xlu2 %371 }
  0x73   : > { %v374_v24 = vsel %vm373_vm2, %v370_v2, %v372_v7  ;;  %v375_v25 = vsel %vm373_vm2, %v372_v7, %v370_v2  ;;  %v322_v2 = vperm.slane %v871_v9, 0 }
  0x74   : > { %v378_v29 = vmul.f32 %v376_v22, %v374_v24  ;;  %v379_v30 = vmul.f32 %v377_v23, %v375_v25 }
  0x7a   : > { %v348_v28 = vpop.permute.xlu2 %347 }
  0x81   : > { %v381_v4 = vpop.permute.xlu1 %380  ;;  %v392_v5 = vpop.permute.xlu0 %391 }
  0x82   : > { %v339_v41 = vpop.permute.xlu2 %338 }
  0x89   : > { %v383_v12 = vpop.permute.xlu1 %382  ;;  %v394_v13 = vpop.permute.xlu0 %393 }
  0x8a   : > { %v385_v16 = vsel %vm384_vm0, %v381_v4, %v383_v12  ;;  %v386_v17 = vsel %vm384_vm0, %v383_v12, %v381_v4  ;;  %v396_v18 = vsel %vm395_vm1, %v392_v5, %v394_v13  ;;  %v397_v19 = vsel %vm395_vm1, %v394_v13, %v392_v5  ;;  %v313_v62 = vpop.permute.xlu2 %312  ;;  %v402_v13 = vld [vmem:[%s1095_s2] sm:$0xff] }
  0x8b   : > { %v400_v20 = vmul.f32 %v878_v10, %v396_v18  ;;  %v401_v21 = vmul.f32 %v883_v11, %v397_v19  ;;  %v389_v26 = vmul.f32 %v387_v14, %v385_v16  ;;  %v390_v27 = vmul.f32 %v388_v15, %v386_v17 }
  0x8c   : > { %v975_v16 = vperm.slane %v866_v8, 4  ;;  %v978_v17 = vperm.slane %v871_v9, 4 }
  0x8d   : > { %414 = vmatpush.msra.mxu0 %v400_v20  ;;  %434 = vmatpush.msra.mxu1 %v401_v21 }
  0x8f   : > { %415 = vmatpush.msra.mxu0 %v389_v26  ;;  %435 = vmatpush.msra.mxu1 %v390_v27 }
  0x91   : > { %v361_v33 = vpop.permute.xlu1 %360  ;;  %416 = vmatpush.msra.mxu0 %v378_v29  ;;  %436 = vmatpush.msra.mxu1 %v379_v30  ;;  %v359_v34 = vpop.permute.xlu0 %358 }
  0x92   : > { %v363_v35 = vsel %vm362_vm3, %v359_v34, %v361_v33  ;;  %v364_v36 = vsel %vm362_vm3, %v361_v33, %v359_v34 }
  0x93   : > { %v367_v37 = vmul.f32 %v365_v31, %v363_v35  ;;  %v368_v38 = vmul.f32 %v366_v32, %v364_v36  ;;  %v763_v36 = vmov 0  }
  0x94   : > { %740 = vset.pattern.permute.xlu0 %v763_v36 }
  0x95   : > { %417 = vmatpush.msra.mxu0 %v367_v37  ;;  %437 = vmatpush.msra.mxu1 %v368_v38  ;;  %v485_v37 = vld [vmem:[%s1097_s4] sm:$0xff] }
  0x96   : > { %488 = vperm.xlu0 %740, %v485_v37  }
  0x97   : > { %418 = vmatpush.msra.mxu0 %v825_v0  ;;  %438 = vmatpush.msra.mxu1 %v833_v1 }
  0x99   : > { %v337_v44 = vpop.permute.xlu1 %336  ;;  %v350_v45 = vpop.permute.xlu0 %349 }
  0x9a   : > { %v352_v46 = vsel %vm351_vm4, %v348_v28, %v350_v45  ;;  %v353_v47 = vsel %vm351_vm4, %v350_v45, %v348_v28  ;;  %v341_v48 = vsel %vm340_vm5, %v337_v44, %v339_v41  ;;  %v342_v49 = vsel %vm340_vm5, %v339_v41, %v337_v44 }
  0x9b   : > { %v356_v50 = vmul.f32 %v354_v39, %v353_v47  ;;  %v357_v51 = vmul.f32 %v355_v40, %v352_v46  ;;  %v345_v52 = vmul.f32 %v343_v42, %v342_v49  ;;  %v346_v53 = vmul.f32 %v344_v43, %v341_v48 }
  0x9d   : > { %419 = vmatpush.msra.mxu0 %v356_v50  ;;  %439 = vmatpush.msra.mxu1 %v357_v51  ;;  %v465_v50 = vld [vmem:[%s1096_s3] sm:$0xff] }
  0x9f   : > { %420 = vmatpush.msra.mxu0 %v345_v52  ;;  %440 = vmatpush.msra.mxu1 %v346_v53 }
  0xa1   : > { %v328_v56 = vpop.permute.xlu1 %327  ;;  %v326_v57 = vpop.permute.xlu0 %325 }
  0xa2   : > { %v330_v58 = vsel %vm329_vm6, %v326_v57, %v328_v56  ;;  %v331_v59 = vsel %vm329_vm6, %v328_v56, %v326_v57 }
  0xa3   : > { %v334_v60 = vmul.f32 %v332_v54, %v331_v59  ;;  %v335_v61 = vmul.f32 %v333_v55, %v330_v58 }
  0xa5   : > { %421 = vmatpush.msra.mxu0 %v334_v60  ;;  %441 = vmatpush.msra.mxu1 %v335_v61 }
  0xa9   : > { %v315_v3 = vpop.permute.xlu0 %314 }
  0xaa   : > { %v319_v4 = vsel %vm318_vm7, %v313_v62, %v315_v3  ;;  %v320_v5 = vsel %vm318_vm7, %v315_v3, %v313_v62 }
  0xab   : > { %v323_v7 = vmul.f32 %v321_v63, %v320_v5  ;;  %v324_v12 = vmul.f32 %v322_v2, %v319_v4 }
  0xad   : > { %422 = vmatpush.msra.mxu0 %v323_v7  ;;  %442 = vmatpush.msra.mxu1 %v324_v12 }
  0xae   : > { %715 = vmatmul.msk.f32.vlgmr.msra.gmra.mxu0 %vm403_vm8, %v402_v13  ;;  %716 = vmatmul.msk.f32.vlgmr.msra.gmra.mxu1 %vm403_vm8, %v402_v13 }
 0x108   : > { %v489_v56 = vpop.permute.xlu0 %488 }
 0x12b   : > { %v424_v18 = vpop.f32.mrf.mxu0  ;;  %v444_v19 = vpop.f32.mrf.mxu1 }
 0x12c   : > { %v449_v20 = vmul.f32 %v975_v16, %v424_v18  ;;  %v450_v21 = vmul.f32 %v978_v17, %v444_v19 }
 0x12e   : > { %v451_v24 = vadd.f32 %v450_v21, %v449_v20 }
 0x130   : > { %452 = vadd.xlane.f32.xlu1 %v451_v24 }
 0x1a3   : > { %v453_v25 = vpop.xlane.xlu1 %452 }
 0x1a4   : > { %v454_v26 = vmul.f32 0.00390625, %v453_v25 }
 0x1a6   : > { %v455_v27 = vsub.f32 %v424_v18, %v454_v26  ;;  %v456_v28 = vsub.f32 %v444_v19, %v454_v26 }
 0x1a8   : > { %v457_v29 = vmul.f32 %v455_v27, %v455_v27  ;;  %v458_v30 = vmul.f32 %v456_v28, %v456_v28 }
 0x1aa   : > { %v459_v33 = vmul.f32 %v457_v29, %v975_v16  ;;  %v460_v34 = vmul.f32 %v458_v30, %v978_v17 }
 0x1ac   : > { %v461_v35 = vadd.f32 %v460_v34, %v459_v33 }
 0x1ae   : > { %462 = vadd.xlane.f32.xlu2 %v461_v35 }
 0x221   : > { %v463_v38 = vpop.xlane.xlu2 %462 }
 0x222   : > { %v464_v41 = vmul.f32 0.00390625, %v463_v38 }
 0x224   : > { %v466_v44 = vadd.f32 1e-05, %v464_v41 }
 0x226   : > { %743 = vrsqrt.f32 %v466_v44  ;;  %vm473_vm10 = vweird.f32 %v466_v44 }
 0x22c   : > { %v744_v45 = vpop.eup %743 }
 0x22d   : > { %v468_v46 = vmul.f32 %v744_v45, %v466_v44  ;;  %vm474_vm9 = vweird.f32 %v744_v45 }
 0x22e   : > { %vm475_vm11 = vmor %vm473_vm10, %vm474_vm9 }
 0x22f   : > { %v469_v47 = vmul.f32 %v744_v45, %v468_v46 }
 0x231   : > { %v470_v48 = vmul.f32 0.5, %v469_v47 }
 0x233   : > { %v471_v49 = vsub.f32 1.5, %v470_v48 }
 0x235   : > { %v472_v51 = vmul.f32 %v744_v45, %v471_v49 }
 0x237   : > { %v476_v52 = vsel %vm475_vm11, %v744_v45, %v472_v51 }
 0x238   : > { %v477_v53 = vmul.f32 %v476_v52, %v465_v50 }
 0x23a   : > { %480 = vperm.xlu0 %740, %v477_v53  }
 0x2ac   : > { %v481_v57 = vpop.permute.xlu0 %480 }
 0x2ad   : > { %v483_v58 = vmul.f32 %v481_v57, %v455_v27  ;;  %v484_v59 = vmul.f32 %v481_v57, %v456_v28 }
 0x2af   : > { %v491_v60 = vadd.f32 %v489_v56, %v483_v58  ;;  %v492_v61 = vadd.f32 %v489_v56, %v484_v59 }
 0x2b1   : > { %v493_v62 = vmax.f32 %v491_v60, 0.0  ;;  %v494_v3 = vmax.f32 %v492_v61, 0.0 }
 0x2b3   : > { %545 = vrot.lane.b32.xlu1 %v494_v3, %s755_s11  ;;  %543 = vrot.lane.b32.xlu2 %v493_v62, %s755_s11 }
 0x2b4   : > { %551 = vrot.lane.b32.xlu0 %v493_v62, %s756_s12 }
 0x2bb   : > { %519 = vrot.lane.b32.xlu1 %v493_v62, %s759_s15  ;;  %529 = vrot.lane.b32.xlu2 %v494_v3, %s758_s14 }
 0x2bc   : > { %553 = vrot.lane.b32.xlu0 %v494_v3, %s756_s12 }
 0x2c3   : > { %513 = vrot.lane.b32.xlu1 %v494_v3, %s760_s16  ;;  %511 = vrot.lane.b32.xlu2 %v493_v62, %s760_s16 }
 0x2c4   : > { %535 = vrot.lane.b32.xlu0 %v493_v62, %s757_s13 }
 0x2cb   : > { %495 = vrot.lane.b32.xlu1 %v493_v62, %s762_s18  ;;  %505 = vrot.lane.b32.xlu2 %v494_v3, %s761_s17 }
 0x2cc   : > { %537 = vrot.lane.b32.xlu0 %v494_v3, %s757_s13 }
 0x2d4   : > { %527 = vrot.lane.b32.xlu0 %v493_v62, %s758_s14 }
 0x2dc   : > { %521 = vrot.lane.b32.xlu0 %v494_v3, %s759_s15 }
 0x2e4   : > { %503 = vrot.lane.b32.xlu0 %v493_v62, %s761_s17 }
 0x2ec   : > { %497 = vrot.lane.b32.xlu0 %v494_v3, %s762_s18 }
 0x30d   : > { %v544_v7 = vpop.permute.xlu2 %543 }
 0x325   : > { %v546_v5 = vpop.permute.xlu1 %545 }
 0x326   : > { %v552_v4 = vpop.permute.xlu0 %551  ;;  %v547_v13 = vsel %vm384_vm0, %v544_v7, %v546_v5  ;;  %v548_v18 = vsel %vm384_vm0, %v546_v5, %v544_v7 }
 0x327   : > { %v549_v25 = vmul.f32 %v547_v13, %v387_v14  ;;  %v550_v26 = vmul.f32 %v548_v18, %v388_v15  ;;  %v530_v14 = vpop.permute.xlu2 %529 }
 0x32d   : > { %v520_v33 = vpop.permute.xlu1 %519 }
 0x32e   : > { %v554_v12 = vpop.permute.xlu0 %553 }
 0x32f   : > { %v555_v19 = vsel %vm395_vm1, %v552_v4, %v554_v12  ;;  %v556_v20 = vsel %vm395_vm1, %v554_v12, %v552_v4 }
 0x330   : > { %v557_v21 = vmul.f32 %v878_v10, %v555_v19  ;;  %v558_v24 = vmul.f32 %v883_v11, %v556_v20 }
 0x332   : > { %570 = vmatpush.msra.mxu2 %v557_v21  ;;  %590 = vmatpush.msra.mxu3 %v558_v24 }
 0x334   : > { %571 = vmatpush.msra.mxu2 %v549_v25  ;;  %591 = vmatpush.msra.mxu3 %v550_v26 }
 0x335   : > { %v514_v37 = vpop.permute.xlu1 %513 }
 0x336   : > { %v536_v27 = vpop.permute.xlu0 %535 }
 0x33e   : > { %v538_v28 = vpop.permute.xlu0 %537 }
 0x33f   : > { %v539_v29 = vsel %vm373_vm2, %v536_v27, %v538_v28  ;;  %v540_v10 = vsel %vm373_vm2, %v538_v28, %v536_v27  ;;  %v639_v28 = vld [vmem:[%s1100_s7] sm:$0xff] }
 0x340   : > { %v541_v11 = vmul.f32 %v539_v29, %v376_v22  ;;  %v542_v30 = vmul.f32 %v540_v10, %v377_v23  ;;  %v512_v23 = vpop.permute.xlu2 %511 }
 0x341   : > { %v515_v41 = vsel %vm340_vm5, %v512_v23, %v514_v37  ;;  %v516_v44 = vsel %vm340_vm5, %v514_v37, %v512_v23 }
 0x342   : > { %572 = vmatpush.msra.mxu2 %v541_v11  ;;  %592 = vmatpush.msra.mxu3 %v542_v30  ;;  %v517_v47 = vmul.f32 %v516_v44, %v343_v42  ;;  %v518_v48 = vmul.f32 %v515_v41, %v344_v43  ;;  %v496_v42 = vpop.permute.xlu1 %495 }
 0x346   : > { %v528_v15 = vpop.permute.xlu0 %527 }
 0x347   : > { %v531_v34 = vsel %vm362_vm3, %v528_v15, %v530_v14  ;;  %v532_v35 = vsel %vm362_vm3, %v530_v14, %v528_v15 }
 0x348   : > { %v533_v36 = vmul.f32 %v531_v34, %v365_v31  ;;  %v534_v22 = vmul.f32 %v532_v35, %v366_v32  ;;  %v506_v49 = vpop.permute.xlu2 %505 }
 0x34a   : > { %573 = vmatpush.msra.mxu2 %v533_v36  ;;  %593 = vmatpush.msra.mxu3 %v534_v22 }
 0x34c   : > { %574 = vmatpush.msra.mxu2 %v493_v62  ;;  %594 = vmatpush.msra.mxu3 %v494_v3 }
 0x34e   : > { %v522_v38 = vpop.permute.xlu0 %521 }
 0x34f   : > { %v523_v45 = vsel %vm351_vm4, %v520_v33, %v522_v38  ;;  %v524_v31 = vsel %vm351_vm4, %v522_v38, %v520_v33 }
 0x350   : > { %v525_v32 = vmul.f32 %v524_v31, %v354_v39  ;;  %v526_v46 = vmul.f32 %v523_v45, %v355_v40 }
 0x352   : > { %575 = vmatpush.msra.mxu2 %v525_v32  ;;  %595 = vmatpush.msra.mxu3 %v526_v46 }
 0x354   : > { %576 = vmatpush.msra.mxu2 %v517_v47  ;;  %596 = vmatpush.msra.mxu3 %v518_v48 }
 0x356   : > { %v504_v50 = vpop.permute.xlu0 %503 }
 0x357   : > { %v507_v51 = vsel %vm329_vm6, %v504_v50, %v506_v49  ;;  %v508_v39 = vsel %vm329_vm6, %v506_v49, %v504_v50 }
 0x358   : > { %v509_v40 = vmul.f32 %v508_v39, %v332_v54  ;;  %v510_v52 = vmul.f32 %v507_v51, %v333_v55  ;;  %v559_v54 = vld [vmem:[%s1098_s5] sm:$0xff] }
 0x35a   : > { %577 = vmatpush.msra.mxu2 %v509_v40  ;;  %597 = vmatpush.msra.mxu3 %v510_v52 }
 0x35e   : > { %v498_v43 = vpop.permute.xlu0 %497 }
 0x35f   : > { %v499_v53 = vsel %vm318_vm7, %v496_v42, %v498_v43  ;;  %v500_v56 = vsel %vm318_vm7, %v498_v43, %v496_v42 }
 0x360   : > { %v501_v57 = vmul.f32 %v500_v56, %v321_v63  ;;  %v502_v58 = vmul.f32 %v499_v53, %v322_v2 }
 0x362   : > { %578 = vmatpush.msra.mxu2 %v501_v57  ;;  %598 = vmatpush.msra.mxu3 %v502_v58 }
 0x363   : > { %717 = vmatmul.msk.f32.vlgmr.msra.gmra.mxu2 %vm403_vm8, %v559_v54  ;;  %718 = vmatmul.msk.f32.vlgmr.msra.gmra.mxu3 %vm403_vm8, %v559_v54 }
 0x3e6   : > { %v580_v55 = vpop.f32.mrf.mxu2  ;;  %v600_v59 = vpop.f32.mrf.mxu3 }
 0x3e7   : > { %v603_v6 = vmul.f32 %v580_v55, %v975_v16  ;;  %v604_v8 = vmul.f32 %v600_v59, %v978_v17 }
 0x3e9   : > { %v605_v63 = vadd.f32 %v604_v8, %v603_v6 }
 0x3eb   : > { %606 = vadd.xlane.f32.xlu2 %v605_v63 }
 0x45e   : > { %v607_v9 = vpop.xlane.xlu2 %606 }
 0x45f   : > { %v608_v2 = vmul.f32 0.00390625, %v607_v9 }
 0x461   : > { %v609_v60 = vsub.f32 %v580_v55, %v608_v2  ;;  %v610_v61 = vsub.f32 %v600_v59, %v608_v2 }
 0x463   : > { %v611_v62 = vmul.f32 %v609_v60, %v609_v60  ;;  %v612_v3 = vmul.f32 %v610_v61, %v610_v61 }
 0x465   : > { %v613_v4 = vmul.f32 %v611_v62, %v975_v16  ;;  %v614_v5 = vmul.f32 %v612_v3, %v978_v17  ;;  %v619_v16 = vld [vmem:[%s1099_s6] sm:$0xff] }
 0x467   : > { %v615_v7 = vadd.f32 %v614_v5, %v613_v4 }
 0x469   : > { %616 = vadd.xlane.f32.xlu1 %v615_v7 }
 0x4dc   : > { %v617_v12 = vpop.xlane.xlu1 %616 }
 0x4dd   : > { %v618_v13 = vmul.f32 0.00390625, %v617_v12 }
 0x4df   : > { %v620_v18 = vadd.f32 1e-05, %v618_v13 }
 0x4e1   : > { %745 = vrsqrt.f32 %v620_v18  ;;  %vm627_vm13 = vweird.f32 %v620_v18 }
 0x4e7   : > { %v746_v19 = vpop.eup %745 }
 0x4e8   : > { %v622_v20 = vmul.f32 %v746_v19, %v620_v18  ;;  %vm628_vm12 = vweird.f32 %v746_v19 }
 0x4e9   : > { %vm629_vm14 = vmor %vm627_vm13, %vm628_vm12 }
 0x4ea   : > { %v623_v21 = vmul.f32 %v746_v19, %v622_v20 }
 0x4ec   : > { %v624_v24 = vmul.f32 0.5, %v623_v21 }
 0x4ee   : > { %v625_v25 = vsub.f32 1.5, %v624_v24 }
 0x4f0   : > { %v626_v26 = vmul.f32 %v746_v19, %v625_v25 }
 0x4f2   : > { %v630_v17 = vsel %vm629_vm14, %v746_v19, %v626_v26 }
 0x4f3   : > { %v631_v27 = vmul.f32 %v630_v17, %v619_v16 }
 0x4f5   : > { %634 = vperm.xlu0 %740, %v631_v27  }
 0x4fd   : > { %642 = vperm.xlu0 %740, %v639_v28  }
 0x567   : > { %v635_v29 = vpop.permute.xlu0 %634 }
 0x568   : > { %v637_v10 = vmul.f32 %v635_v29, %v609_v60  ;;  %v638_v11 = vmul.f32 %v635_v29, %v610_v61 }
 0x56f   : > { %v643_v30 = vpop.permute.xlu0 %642 }
 0x570   : > { %v645_v14 = vadd.f32 %v643_v30, %v637_v10  ;;  %v646_v33 = vadd.f32 %v643_v30, %v638_v11 }
 0x572   : > { %v647_v15 = vadd.f32 %v645_v14, %v825_v0  ;;  %v648_v34 = vadd.f32 %v646_v33, %v833_v1 }
 0x574   : > { %649 = vst [vmem:[%s305_s22] sm:$0xff] %v647_v15 }
 0x575   : > { %650 = vst [vmem:[%s305_s22 + $0x8] sm:$0xff] %v648_v34 }
 0x576 PF: > { %s18_s27 = sadd.s32 1, %s753_s27  }
 0x577   : > { %p15_p4 = scmp.ge.s32.totalorder %s18_s27, 4  }
 0x579   :  { %17 = sbr.rel (!%p15_p4) target bundleno = 1 (0x1), region = 82 }

</bundles_post_ra>
